<compile_context>
chip_gen: v5e
topology: v5e:2x2
jax: 0.10.0
libtpu: 0.0.40
codegen_flags: <defaults>
</compile_context>

<pallas_src>
import functools
import math

import jax
import jax.numpy as jnp
from jax.experimental import pallas as pl
from jax.experimental.pallas import tpu as pltpu

F32 = jnp.float32
BF16 = jnp.bfloat16


def _round_up(x, m):
    return (x + m - 1) // m * m


def _row_tile(n, target):
    """Largest tile <= target that divides n (multiple of 8 unless it equals n)."""
    if n <= target:
        return n
    for d in range(min(n, target), 0, -1):
        if n % d == 0 and d % 8 == 0:
            return d
    return n


def _mxu_tiles():
    """Per-generation MXU tile caps (tm, tn, tk)."""
    try:
        kind = jax.devices()[0].device_kind.lower()
    except Exception:
        return 256, 256, 512
    if "v5 lite" in kind or "v5e" in kind or "v5lite" in kind:
        return 128, 128, 512          # 4x 128^2 MXU, most HBM-bound
    if "v7" in kind:
        return 256, 256, 256          # 64 MiB physical VMEM budget
    return 256, 256, 512              # v6e / default


_TM_MAX, _TN_MAX, _TK_MAX = _mxu_tiles()


# ----------------------------------------------------------------------------
# Tiled matmul with fused bias / activation epilogue (bf16 in, f32 acc)
# ----------------------------------------------------------------------------

def _matmul_kernel(a_ref, b_ref, bias_ref, o_ref, acc_ref, *, activation):
    k = pl.program_id(2)

    @pl.when(k == 0)
    def _():
        acc_ref[...] = jnp.zeros_like(acc_ref)

    acc_ref[...] += jnp.dot(a_ref[...], b_ref[...],
                            preferred_element_type=jnp.float32)

    @pl.when(k == pl.num_programs(2) - 1)
    def _():
        r = acc_ref[...] + bias_ref[...]
        if activation == "gelu":      # tanh approximation (EUP-friendly)
            r = 0.5 * r * (1.0 + jnp.tanh(0.7978845608028654 *
                                          (r + 0.044715 * r * r * r)))
        elif activation == "relu":
            r = jnp.maximum(r, 0.0)
        o_ref[...] = r.astype(o_ref.dtype)


@functools.partial(jax.jit, static_argnames=("activation",))
def matmul(a, b, bias=None, activation=None):
    """(M,K) @ (K,N) + bias on the MXU; bf16 inputs, f32 accumulation."""
    M, K = a.shape
    K2, N = b.shape
    assert K == K2
    Mp = _round_up(M, 8)
    tm = Mp if Mp <= _TM_MAX else _TM_MAX
    Mp = _round_up(Mp, tm)
    tn = N if N <= _TN_MAX else _TN_MAX
    Np = _round_up(N, tn)
    tk = K if K <= _TK_MAX else _TK_MAX
    Kp = _round_up(K, tk)

    a_p = a.astype(BF16)
    if (Mp, Kp) != (M, K):
        a_p = jnp.pad(a_p, ((0, Mp - M), (0, Kp - K)))
    b_p = b.astype(BF16)
    if (Kp, Np) != (K, N):
        b_p = jnp.pad(b_p, ((0, Kp - K), (0, Np - N)))
    if bias is None:
        bias_p = jnp.zeros((1, Np), F32)
    else:
        bias_p = bias.reshape(1, N).astype(F32)
        if Np != N:
            bias_p = jnp.pad(bias_p, ((0, 0), (0, Np - N)))

    out = pl.pallas_call(
        functools.partial(_matmul_kernel, activation=activation),
        out_shape=jax.ShapeDtypeStruct((Mp, Np), F32),
        grid_spec=pltpu.PrefetchScalarGridSpec(
            num_scalar_prefetch=0,
            grid=(Mp // tm, Np // tn, Kp // tk),
            in_specs=[pl.BlockSpec((tm, tk), lambda i, j, k: (i, k)),
                      pl.BlockSpec((tk, tn), lambda i, j, k: (k, j)),
                      pl.BlockSpec((1, tn), lambda i, j, k: (0, j))],
            out_specs=pl.BlockSpec((tm, tn), lambda i, j, k: (i, j)),
            scratch_shapes=[pltpu.VMEM((tm, tn), jnp.float32)]),
        compiler_params=pltpu.CompilerParams(
            dimension_semantics=("parallel", "parallel", "arbitrary")),
    )(a_p, b_p, bias_p)
    if (Mp, Np) != (M, N):
        out = out[:M, :N]
    return out


# ----------------------------------------------------------------------------
# Direct (im2col-free) stride-1 convolution kernel
# ----------------------------------------------------------------------------

def _conv_kernel(x_ref, w_ref, b_ref, o_ref, acc_ref, *, kw, dilation, ow,
                 activation):
    ky = pl.program_id(2)

    @pl.when(ky == 0)
    def _():
        acc_ref[...] = jnp.zeros_like(acc_ref)

    for kx in range(kw):                                   # unrolled taps
        xs = x_ref[0, 0, kx * dilation: kx * dilation + ow, :]
        acc_ref[...] += jnp.dot(xs, w_ref[ky * kw + kx],
                                preferred_element_type=jnp.float32)

    @pl.when(ky == pl.num_programs(2) - 1)
    def _():
        r = acc_ref[...] + b_ref[...]
        if activation == "tanh01":
            r = (jnp.tanh(r) + 1.0) * 0.5
        elif activation == "relu":
            r = jnp.maximum(r, 0.0)
        o_ref[0, 0] = r.astype(o_ref.dtype)


@functools.partial(jax.jit, static_argnames=("dilation", "activation"))
def conv2d(x, w, b, dilation=1, activation=None):
    """Stride-1 'valid' conv on a pre-padded NHWC input.  w: (OC, IC, kh, kw)."""
    N, Hp, Wp, C = x.shape
    OC, IC, kh, kw = w.shape
    assert IC == C
    OH = Hp - (kh - 1) * dilation
    OW = Wp - (kw - 1) * dilation

    xb = x.astype(BF16)
    wm = jnp.transpose(w, (2, 3, 1, 0)).reshape(kh * kw, IC, OC).astype(BF16)
    bias = (jnp.zeros((OC,), F32) if b is None else b.astype(F32)).reshape(1, OC)

    return pl.pallas_call(
        functools.partial(_conv_kernel, kw=kw, dilation=dilation, ow=OW,
                          activation=activation),
        out_shape=jax.ShapeDtypeStruct((N, OH, OW, OC), F32),
        grid_spec=pltpu.PrefetchScalarGridSpec(
            num_scalar_prefetch=0,
            grid=(N, OH, kh),
            in_specs=[
                pl.BlockSpec((1, 1, Wp, C),
                             lambda n, oh, ky: (n, oh + ky * dilation, 0, 0)),
                pl.BlockSpec((kh * kw, IC, OC), lambda n, oh, ky: (0, 0, 0)),
                pl.BlockSpec((1, OC), lambda n, oh, ky: (0, 0)),
            ],
            out_specs=pl.BlockSpec((1, 1, OW, OC),
                                   lambda n, oh, ky: (n, oh, 0, 0)),
            scratch_shapes=[pltpu.VMEM((OW, OC), jnp.float32)]),
        compiler_params=pltpu.CompilerParams(
            dimension_semantics=("parallel", "parallel", "arbitrary")),
    )(xb, wm, bias)


def conv2d_stride2(x, w, b):
    """PyTorch Conv2d(k=4, stride=2, padding=1) via space-to-depth + 2x2/s1 conv."""
    N, H, W, C = x.shape
    OC, IC, kh, kw = w.shape
    assert (kh, kw) == (4, 4) and IC == C
    xp = jnp.pad(x, ((0, 0), (1, 1), (1, 1), (0, 0)))
    Hb, Wb = (H + 2) // 2, (W + 2) // 2
    xs = xp.reshape(N, Hb, 2, Wb, 2, C).transpose(0, 1, 3, 2, 4, 5)
    xs = xs.reshape(N, Hb, Wb, 4 * C)
    # w2[oc, (sy, sx, ic), dky, dkx] = w[oc, ic, 2*dky + sy, 2*dkx + sx]
    w2 = w.reshape(OC, IC, 2, 2, 2, 2).transpose(0, 3, 5, 1, 2, 4)
    w2 = w2.reshape(OC, 4 * IC, 2, 2)
    return conv2d(xs, w2, b)


def conv_transpose2d(x, w, b):
    """PyTorch ConvTranspose2d(k=4, stride=2, padding=1), w: (IC, OC, 4, 4).

    Sub-pixel formulation: four 2x2/s1 convs on the zero-padded input and an
    interleave -- same math, no zero-stuffed dilation (~4x fewer MACs/bytes).
    """
    N, H, W, C = x.shape
    IC, OC, kh, kw = w.shape
    assert (kh, kw) == (4, 4) and IC == C
    ky_sel = ((3, 1), (2, 0))            # taps feeding even / odd output rows
    sub_ws, offs = [], []
    for dy in (0, 1):
        for dx in (0, 1):
            wk = w[:, :, ky_sel[dy], :][:, :, :, ky_sel[dx]]   # (IC, OC, 2, 2)
            sub_ws.append(jnp.transpose(wk, (1, 0, 2, 3)))     # (OC, IC, 2, 2)
            offs.append((dy, dx))
    w_all = jnp.concatenate(sub_ws, axis=0)                    # (4*OC, IC, 2, 2)
    b_all = None if b is None else jnp.concatenate([b, b, b, b])
    xp = jnp.pad(x, ((0, 0), (1, 1), (1, 1), (0, 0)))
    y = conv2d(xp, w_all, b_all)                               # (N, H+1, W+1, 4*OC)
    subs = [y[:, dy:dy + H, dx:dx + W, i * OC:(i + 1) * OC]
            for i, (dy, dx) in enumerate(offs)]
    out = jnp.stack(subs, axis=3).reshape(N, H, W, 2, 2, OC)
    out = out.transpose(0, 1, 3, 2, 4, 5).reshape(N, 2 * H, 2 * W, OC)
    return out


# ----------------------------------------------------------------------------
# InstanceNorm (NHWC, two-pass, tiled) with fused ReLU / residual
# ----------------------------------------------------------------------------

def _in_stats_kernel(x_ref, s_ref, ss_ref):
    @pl.when(pl.program_id(1) == 0)
    def _():
        s_ref[...] = jnp.zeros_like(s_ref)
        ss_ref[...] = jnp.zeros_like(ss_ref)

    x = x_ref[0]                                               # (th, W, C) f32
    s_ref[0] += jnp.sum(jnp.sum(x, axis=0), axis=0, keepdims=True)
    ss_ref[0] += jnp.sum(jnp.sum(x * x, axis=0), axis=0, keepdims=True)


def _in_apply_kernel(*refs, inv_hw, relu, has_res):
    if has_res:
        x_ref, s_ref, ss_ref, r_ref, o_ref = refs
    else:
        x_ref, s_ref, ss_ref, o_ref = refs
        r_ref = None
    x = x_ref[0]                                               # (th, W, C)
    mean = s_ref[0] * inv_hw                                   # (1, C)
    var = ss_ref[0] * inv_hw - mean * mean
    y = (x - mean) * jax.lax.rsqrt(var + 1e-5)
    if relu:
        y = jnp.maximum(y, 0.0)
    if has_res:
        y = y + r_ref[0]
    o_ref[0] = y.astype(o_ref.dtype)


@functools.partial(jax.jit, static_argnames=("relu",))
def instance_norm_nhwc(x, relu=False, residual=None):
    """InstanceNorm2d (affine=False, eps=1e-5) on NHWC; optional ReLU / residual."""
    N, H, W, C = x.shape
    th = _row_tile(H, max(8, (2 * 1024 * 1024) // max(1, W * C * 4)))
    hb = H // th

    x_spec = pl.BlockSpec((1, th, W, C), lambda n, h: (n, h, 0, 0))
    s_spec = pl.BlockSpec((1, 1, C), lambda n, h: (n, 0, 0))

    ssum, ssq = pl.pallas_call(
        _in_stats_kernel,
        out_shape=(jax.ShapeDtypeStruct((N, 1, C), F32),
                   jax.ShapeDtypeStruct((N, 1, C), F32)),
        grid_spec=pltpu.PrefetchScalarGridSpec(
            num_scalar_prefetch=0, grid=(N, hb),
            in_specs=[x_spec],
            out_specs=(s_spec, s_spec)),
        compiler_params=pltpu.CompilerParams(
            dimension_semantics=("parallel", "arbitrary")),
    )(x)

    has_res = residual is not None
    in_specs = [x_spec, s_spec, s_spec]
    args = [x, ssum, ssq]
    if has_res:
        in_specs.append(x_spec)
        args.append(residual)

    return pl.pallas_call(
        functools.partial(_in_apply_kernel, inv_hw=1.0 / (H * W), relu=relu,
                          has_res=has_res),
        out_shape=jax.ShapeDtypeStruct((N, H, W, C), F32),
        grid_spec=pltpu.PrefetchScalarGridSpec(
            num_scalar_prefetch=0, grid=(N, hb),
            in_specs=in_specs,
            out_specs=x_spec),
        compiler_params=pltpu.CompilerParams(
            dimension_semantics=("parallel", "parallel")),
    )(*args)


# ----------------------------------------------------------------------------
# LayerNorm (row-tiled) and fused attention
# ----------------------------------------------------------------------------

def _layer_norm_kernel(x_ref, g_ref, b_ref, o_ref):
    x = x_ref[...]
    mean = jnp.mean(x, axis=-1, keepdims=True)
    var = jnp.mean(jnp.square(x - mean), axis=-1, keepdims=True)
    o_ref[...] = (x - mean) * jax.lax.rsqrt(var + 1e-5) * g_ref[...] + b_ref[...]


@jax.jit
def layer_norm(x2d, gamma, beta):
    R, D = x2d.shape
    tr = _row_tile(R, 256)
    return pl.pallas_call(
        _layer_norm_kernel,
        out_shape=jax.ShapeDtypeStruct((R, D), F32),
        grid_spec=pltpu.PrefetchScalarGridSpec(
            num_scalar_prefetch=0, grid=(R // tr,),
            in_specs=[pl.BlockSpec((tr, D), lambda i: (i, 0)),
                      pl.BlockSpec((1, D), lambda i: (0, 0)),
                      pl.BlockSpec((1, D), lambda i: (0, 0))],
            out_specs=pl.BlockSpec((tr, D), lambda i: (i, 0))),
        compiler_params=pltpu.CompilerParams(dimension_semantics=("parallel",)),
    )(x2d, gamma.reshape(1, -1).astype(F32), beta.reshape(1, -1).astype(F32))


def _attn_kernel(q_ref, k_ref, v_ref, o_ref, *, scale):
    q = q_ref[0]                                               # (T, dh) bf16
    k = k_ref[0]
    v = v_ref[0]
    s = jax.lax.dot_general(q, k, (((1,), (1,)), ((), ())),
                            preferred_element_type=jnp.float32) * scale
    m = jnp.max(s, axis=-1, keepdims=True)
    e = jnp.exp(s - m)
    p = e * pl.reciprocal(jnp.sum(e, axis=-1, keepdims=True), approx=True)
    o = jax.lax.dot_general(p.astype(v.dtype), v, (((1,), (0,)), ((), ())),
                            preferred_element_type=jnp.float32)
    o_ref[0] = o.astype(o_ref.dtype)


@jax.jit
def fused_attention(q, k, v):
    """softmax(q k^T / sqrt(dh)) v, one grid step per (batch*head)."""
    BH, T, dh = q.shape
    scale = 1.0 / math.sqrt(dh)
    spec = pl.BlockSpec((1, T, dh), lambda b: (b, 0, 0))
    return pl.pallas_call(
        functools.partial(_attn_kernel, scale=scale),
        out_shape=jax.ShapeDtypeStruct((BH, T, dh), F32),
        grid_spec=pltpu.PrefetchScalarGridSpec(
            num_scalar_prefetch=0, grid=(BH,),
            in_specs=[spec, spec, spec],
            out_specs=spec),
        compiler_params=pltpu.CompilerParams(dimension_semantics=("parallel",)),
    )(q.astype(BF16), k.astype(BF16), v.astype(BF16))


# ----------------------------------------------------------------------------
# Module forward passes
# ----------------------------------------------------------------------------

def reflect_pad(x, p):
    return jnp.pad(x, ((0, 0), (p, p), (p, p), (0, 0)), mode="reflect")


def conv1x1(x, w, b):
    N, H, W, C = x.shape
    OC = w.shape[0]
    wm = jnp.transpose(w[:, :, 0, 0], (1, 0))                  # (IC, OC)
    out = matmul(x.reshape(N * H * W, C), wm, bias=b)
    return out.reshape(N, H, W, OC)


def resnet_block(x, p, dilation):
    h = reflect_pad(x, dilation)
    h = conv2d(h, p["w1"], p["b1"], dilation=dilation)
    h = instance_norm_nhwc(h, relu=True)
    h = reflect_pad(h, 1)
    h = conv2d(h, p["w2"], p["b2"])
    return instance_norm_nhwc(h, relu=False, residual=x)       # x + IN(conv(...))


def feature_fusion(feat, attn, p):
    # NOTE: the same resblock weights are applied twice, as in the reference.
    attn = resnet_block(attn, p["res"], dilation=1)
    feat = feat + attn
    feat = resnet_block(feat, p["res"], dilation=1)
    return conv1x1(feat, p["w1x1"], p["b1x1"])


def vit_forward(x, p):
    """Shape-preserving ViT block operating on an NHWC feature map."""
    N, H, W, C = x.shape
    ps, D, heads = p["patch"], p["dim"], p["heads"]
    gh, gw = H // ps, W // ps
    T = gh * gw
    dh = D // heads

    tok = x.reshape(N, gh, ps, gw, ps, C).transpose(0, 1, 3, 2, 4, 5)
    tok = tok.reshape(N * T, ps * ps * C)
    tok = matmul(tok, p["embed_w"], bias=p["embed_b"])
    tok = tok.reshape(N, T, D) + p["pos"][None, :, :]

    def split_heads(t):
        return t.reshape(N, T, heads, dh).transpose(0, 2, 1, 3) \
                .reshape(N * heads, T, dh)

    for lyr in p["layers"]:
        h = layer_norm(tok.reshape(N * T, D), lyr["ln1_g"], lyr["ln1_b"])
        wqkv = jnp.concatenate([lyr["wq"], lyr["wk"], lyr["wv"]], axis=1)
        bqkv = jnp.concatenate([lyr["bq"], lyr["bk"], lyr["bv"]])
        qkv = matmul(h, wqkv, bias=bqkv)                       # (N*T, 3D)
        q, k, v = qkv[:, :D], qkv[:, D:2 * D], qkv[:, 2 * D:]

        ctx = fused_attention(split_heads(q), split_heads(k), split_heads(v))
        ctx = ctx.reshape(N, heads, T, dh).transpose(0, 2, 1, 3) \
                 .reshape(N * T, D)
        ctx = matmul(ctx, lyr["wo"], bias=lyr["bo"])
        tok = tok + ctx.reshape(N, T, D)

        h = layer_norm(tok.reshape(N * T, D), lyr["ln2_g"], lyr["ln2_b"])
        h = matmul(h, lyr["w1"], bias=lyr["b1"], activation="gelu")
        h = matmul(h, lyr["w2"], bias=lyr["b2"])
        tok = tok + h.reshape(N, T, D)

    tok = layer_norm(tok.reshape(N * T, D), p["lnf_g"], p["lnf_b"])
    out = matmul(tok, p["out_w"], bias=p["out_b"])
    out = out.reshape(N, gh, gw, ps, ps, C).transpose(0, 1, 3, 2, 4, 5)
    return out.reshape(N, H, W, C)


def inpaint_generator_forward(x_nchw, params):
    x = jnp.transpose(x_nchw.astype(F32), (0, 2, 3, 1))        # NCHW -> NHWC

    # encoder1 + vit + fusion1
    h = conv2d(reflect_pad(x, 3), params["enc1"]["w"], params["enc1"]["b"])
    x1 = instance_norm_nhwc(h, relu=True)
    x1 = feature_fusion(x1, vit_forward(x1, params["vit1"]), params["fusion1"])

    # encoder2 + vit + fusion2
    h = conv2d_stride2(x1, params["enc2"]["w"], params["enc2"]["b"])
    x2 = instance_norm_nhwc(h, relu=True)
    x2 = feature_fusion(x2, vit_forward(x2, params["vit2"]), params["fusion2"])

    # encoder3 + vit + fusion3
    h = conv2d_stride2(x2, params["enc3"]["w"], params["enc3"]["b"])
    x3 = instance_norm_nhwc(h, relu=True)
    x3 = feature_fusion(x3, vit_forward(x3, params["vit3"]), params["fusion3"])

    # middle residual blocks (dilation=4)
    x4 = x3
    for bp in params["middle"]:
        x4 = resnet_block(x4, bp, dilation=4)

    # decoders (sub-pixel transposed convs) + fused final (tanh+1)/2
    h = conv_transpose2d(x4, params["dec3"]["w"], params["dec3"]["b"])
    x5 = instance_norm_nhwc(h, relu=True)
    h = conv_transpose2d(x5, params["dec2"]["w"], params["dec2"]["b"])
    x6 = instance_norm_nhwc(h, relu=True)
    x7 = conv2d(reflect_pad(x6, 3), params["dec1"]["w"], params["dec1"]["b"],
                activation="tanh01")
    return jnp.transpose(x7, (0, 3, 1, 2))                     # back to NCHW


# ----------------------------------------------------------------------------
# Deterministic parameter initialization (init_weights 'normal', gain=0.02)
# ----------------------------------------------------------------------------

class _KeyGen:
    def __init__(self, key):
        self._key = key

    def __call__(self):
        self._key, k = jax.random.split(self._key)
        return k


def _normal(kg, shape, gain=0.02):
    return gain * jax.random.normal(kg(), shape, F32)


def _resblock_params(kg, dim):
    return {"w1": _normal(kg, (dim, dim, 3, 3)), "b1": jnp.zeros((dim,), F32),
            "w2": _normal(kg, (dim, dim, 3, 3)), "b2": jnp.zeros((dim,), F32)}


def _fusion_params(kg, dim):
    return {"res": _resblock_params(kg, dim),
            "w1x1": _normal(kg, (dim, dim, 1, 1)),
            "b1x1": jnp.zeros((dim,), F32)}


def _vit_params(kg, patch, dim, depth, heads, channels, size):
    pdim = patch * patch * channels
    tokens = (size // patch) ** 2
    layers = []
    for _ in range(depth):
        layers.append({
            "ln1_g": jnp.ones((dim,), F32), "ln1_b": jnp.zeros((dim,), F32),
            "wq": _normal(kg, (dim, dim)), "bq": jnp.zeros((dim,), F32),
            "wk": _normal(kg, (dim, dim)), "bk": jnp.zeros((dim,), F32),
            "wv": _normal(kg, (dim, dim)), "bv": jnp.zeros((dim,), F32),
            "wo": _normal(kg, (dim, dim)), "bo": jnp.zeros((dim,), F32),
            "ln2_g": jnp.ones((dim,), F32), "ln2_b": jnp.zeros((dim,), F32),
            "w1": _normal(kg, (dim, 4 * dim)), "b1": jnp.zeros((4 * dim,), F32),
            "w2": _normal(kg, (4 * dim, dim)), "b2": jnp.zeros((dim,), F32),
        })
    return {"patch": patch, "dim": dim, "heads": heads,
            "embed_w": _normal(kg, (pdim, dim)),
            "embed_b": jnp.zeros((dim,), F32),
            "pos": _normal(kg, (tokens, dim)),
            "layers": layers,
            "lnf_g": jnp.ones((dim,), F32), "lnf_b": jnp.zeros((dim,), F32),
            "out_w": _normal(kg, (dim, pdim)),
            "out_b": jnp.zeros((pdim,), F32)}


def init_params(key, input_size=32, residual_blocks=8):
    kg = _KeyGen(key)
    p = {}
    p["enc1"] = {"w": _normal(kg, (64, 4, 7, 7)), "b": jnp.zeros((64,), F32)}
    p["enc2"] = {"w": _normal(kg, (128, 64, 4, 4)), "b": jnp.zeros((128,), F32)}
    p["enc3"] = {"w": _normal(kg, (256, 128, 4, 4)), "b": jnp.zeros((256,), F32)}
    s1, s2, s3 = input_size, input_size // 2, input_size // 4
    # TODO(synk): the ViT class is not defined in the reference source; a standard
    # shape-preserving patch-embed transformer (depth=4, heads=8, dim=channels) is
    # used, with patch sizes scaled to the small test resolution (original: patch 16).
    p["vit1"] = _vit_params(kg, patch=s1 // 4, dim=64, depth=4, heads=8,
                            channels=64, size=s1)
    p["vit2"] = _vit_params(kg, patch=s2 // 4, dim=128, depth=4, heads=8,
                            channels=128, size=s2)
    p["vit3"] = _vit_params(kg, patch=s3 // 4, dim=256, depth=4, heads=8,
                            channels=256, size=s3)
    p["fusion1"] = _fusion_params(kg, 64)
    p["fusion2"] = _fusion_params(kg, 128)
    p["fusion3"] = _fusion_params(kg, 256)
    p["middle"] = [_resblock_params(kg, 256) for _ in range(residual_blocks)]
    p["dec3"] = {"w": _normal(kg, (256, 128, 4, 4)), "b": jnp.zeros((128,), F32)}
    p["dec2"] = {"w": _normal(kg, (128, 64, 4, 4)), "b": jnp.zeros((64,), F32)}
    p["dec1"] = {"w": _normal(kg, (3, 64, 7, 7)), "b": jnp.zeros((3,), F32)}
    return p


# ----------------------------------------------------------------------------

if __name__ == "__main__":
    key = jax.random.PRNGKey(0)
    k_in, k_par = jax.random.split(key)

    # Small test shape consistent with the 4-channel NCHW input of the module.
    x = jax.random.normal(k_in, (1, 4, 32, 32), F32)
    params = init_params(k_par, input_size=32, residual_blocks=8)

    y = inpaint_generator_forward(x, params)
    y = jax.block_until_ready(y)

    assert y.shape == (1, 3, 32, 32), y.shape
    assert bool(jnp.all(jnp.isfinite(y)))
    assert bool(jnp.all(y >= 0.0)) and bool(jnp.all(y <= 1.0))
    print("KERNEL_OK")
</pallas_src>

<mosaic_0001>
module attributes {stable_mosaic.version = 11 : i64} {
  func.func @_conv_kernel(%arg0: i32, %arg1: i32, %arg2: i32, %arg3: memref<1x1x38x4xbf16, #tpu.memory_space<vmem>>, %arg4: memref<49x4x64xbf16, #tpu.memory_space<vmem>>, %arg5: memref<1x64xf32, #tpu.memory_space<vmem>>, %arg6: memref<1x1x32x64xf32, #tpu.memory_space<vmem>>, %arg7: memref<32x64xf32, #tpu.memory_space<vmem>>) attributes {dimension_semantics = [#tpu.dimension_semantics<parallel>, #tpu.dimension_semantics<parallel>, #tpu.dimension_semantics<arbitrary>], iteration_bounds = array<i64: 1, 32, 7>, scalar_prefetch = 0 : i64, scratch_operands = 1 : i64, tpu.core_type = #tpu.core_type<tc>, window_params = [{transform_indices = @transform_0, window_bounds = array<i64: 1, 1, 38, 4>}, {pipeline_mode = #tpu.pipeline_mode<synchronous>, transform_indices = @transform_1, window_bounds = array<i64: 49, 4, 64>}, {pipeline_mode = #tpu.pipeline_mode<synchronous>, transform_indices = @transform_2, window_bounds = array<i64: 1, 64>}, {transform_indices = @transform_3, window_bounds = array<i64: 1, 1, 32, 64>}]} {
    %c0_i32 = arith.constant 0 : i32
    %0 = arith.cmpi eq, %arg2, %c0_i32 : i32
    %1 = arith.extui %0 : i1 to i32
    %c0_i32_0 = arith.constant 0 : i32
    %2 = arith.cmpi ne, %1, %c0_i32_0 : i32
    scf.if %2 {
      %cst_79 = arith.constant 0.000000e+00 : f32
      %83 = vector.broadcast %cst_79 : f32 to vector<32x64xf32>
      %c0_80 = arith.constant 0 : index
      %c0_81 = arith.constant 0 : index
      %84 = vector.load %arg7[%c0_80, %c0_81] : memref<32x64xf32, #tpu.memory_space<vmem>>, vector<32x64xf32>
      tpu.vector_store %arg7[%c0_80, %c0_81], %83 {strides = array<i32>} : memref<32x64xf32, #tpu.memory_space<vmem>>, vector<32x64xf32>,
    } else {
    }
    %c0 = arith.constant 0 : index
    %c0_1 = arith.constant 0 : index
    %c0_2 = arith.constant 0 : index
    %c0_3 = arith.constant 0 : index
    %3 = vector.load %arg3[%c0, %c0_1, %c0_2, %c0_3] : memref<1x1x38x4xbf16, #tpu.memory_space<vmem>>, vector<1x1x32x4xbf16>
    %4 = vector.shape_cast %3 : vector<1x1x32x4xbf16> to vector<32x4xbf16>
    %c0_4 = arith.constant 0 : index
    %c0_5 = arith.constant 0 : index
    %5 = vector.load %arg7[%c0_4, %c0_5] : memref<32x64xf32, #tpu.memory_space<vmem>>, vector<32x64xf32>
    %c7_i32 = arith.constant 7 : i32
    %6 = arith.muli %arg2, %c7_i32 : i32
    %c0_i32_6 = arith.constant 0 : i32
    %7 = arith.addi %6, %c0_i32_6 : i32
    %8 = arith.index_cast %7 : i32 to index
    %c0_7 = arith.constant 0 : index
    %c0_8 = arith.constant 0 : index
    %9 = vector.load %arg4[%8, %c0_7, %c0_8] : memref<49x4x64xbf16, #tpu.memory_space<vmem>>, vector<1x4x64xbf16>
    %10 = vector.shape_cast %9 : vector<1x4x64xbf16> to vector<4x64xbf16>
    %cst = arith.constant dense<0.000000e+00> : vector<32x64xf32>
    %11 = tpu.matmul %4, %10, %cst {dimension_numbers = #tpu.dot_dimension_numbers<[1], [0], [0], [1], [0, 0, 1, 1], [], []>} : vector<32x4xbf16>, vector<4x64xbf16>, vector<32x64xf32> -> vector<32x64xf32>
    %12 = arith.addf %5, %11 : vector<32x64xf32>
    %c0_9 = arith.constant 0 : index
    %c0_10 = arith.constant 0 : index
    %13 = vector.load %arg7[%c0_9, %c0_10] : memref<32x64xf32, #tpu.memory_space<vmem>>, vector<32x64xf32>
    tpu.vector_store %arg7[%c0_9, %c0_10], %12 {strides = array<i32>} : memref<32x64xf32, #tpu.memory_space<vmem>>, vector<32x64xf32>,
    %c0_11 = arith.constant 0 : index
    %c0_12 = arith.constant 0 : index
    %c1 = arith.constant 1 : index
    %c0_13 = arith.constant 0 : index
    %14 = vector.load %arg3[%c0_11, %c0_12, %c1, %c0_13] : memref<1x1x38x4xbf16, #tpu.memory_space<vmem>>, vector<1x1x32x4xbf16>
    %15 = vector.shape_cast %14 : vector<1x1x32x4xbf16> to vector<32x4xbf16>
    %c0_14 = arith.constant 0 : index
    %c0_15 = arith.constant 0 : index
    %16 = vector.load %arg7[%c0_14, %c0_15] : memref<32x64xf32, #tpu.memory_space<vmem>>, vector<32x64xf32>
    %c7_i32_16 = arith.constant 7 : i32
    %17 = arith.muli %arg2, %c7_i32_16 : i32
    %c1_i32 = arith.constant 1 : i32
    %18 = arith.addi %17, %c1_i32 : i32
    %19 = arith.index_cast %18 : i32 to index
    %c0_17 = arith.constant 0 : index
    %c0_18 = arith.constant 0 : index
    %20 = vector.load %arg4[%19, %c0_17, %c0_18] : memref<49x4x64xbf16, #tpu.memory_space<vmem>>, vector<1x4x64xbf16>
    %21 = vector.shape_cast %20 : vector<1x4x64xbf16> to vector<4x64xbf16>
    %cst_19 = arith.constant dense<0.000000e+00> : vector<32x64xf32>
    %22 = tpu.matmul %15, %21, %cst_19 {dimension_numbers = #tpu.dot_dimension_numbers<[1], [0], [0], [1], [0, 0, 1, 1], [], []>} : vector<32x4xbf16>, vector<4x64xbf16>, vector<32x64xf32> -> vector<32x64xf32>
    %23 = arith.addf %16, %22 : vector<32x64xf32>
    %c0_20 = arith.constant 0 : index
    %c0_21 = arith.constant 0 : index
    %24 = vector.load %arg7[%c0_20, %c0_21] : memref<32x64xf32, #tpu.memory_space<vmem>>, vector<32x64xf32>
    tpu.vector_store %arg7[%c0_20, %c0_21], %23 {strides = array<i32>} : memref<32x64xf32, #tpu.memory_space<vmem>>, vector<32x64xf32>,
    %c0_22 = arith.constant 0 : index
    %c0_23 = arith.constant 0 : index
    %c2 = arith.constant 2 : index
    %c0_24 = arith.constant 0 : index
    %25 = vector.load %arg3[%c0_22, %c0_23, %c2, %c0_24] : memref<1x1x38x4xbf16, #tpu.memory_space<vmem>>, vector<1x1x32x4xbf16>
    %26 = vector.shape_cast %25 : vector<1x1x32x4xbf16> to vector<32x4xbf16>
    %c0_25 = arith.constant 0 : index
    %c0_26 = arith.constant 0 : index
    %27 = vector.load %arg7[%c0_25, %c0_26] : memref<32x64xf32, #tpu.memory_space<vmem>>, vector<32x64xf32>
    %c7_i32_27 = arith.constant 7 : i32
    %28 = arith.muli %arg2, %c7_i32_27 : i32
    %c2_i32 = arith.constant 2 : i32
    %29 = arith.addi %28, %c2_i32 : i32
    %30 = arith.index_cast %29 : i32 to index
    %c0_28 = arith.constant 0 : index
    %c0_29 = arith.constant 0 : index
    %31 = vector.load %arg4[%30, %c0_28, %c0_29] : memref<49x4x64xbf16, #tpu.memory_space<vmem>>, vector<1x4x64xbf16>
    %32 = vector.shape_cast %31 : vector<1x4x64xbf16> to vector<4x64xbf16>
    %cst_30 = arith.constant dense<0.000000e+00> : vector<32x64xf32>
    %33 = tpu.matmul %26, %32, %cst_30 {dimension_numbers = #tpu.dot_dimension_numbers<[1], [0], [0], [1], [0, 0, 1, 1], [], []>} : vector<32x4xbf16>, vector<4x64xbf16>, vector<32x64xf32> -> vector<32x64xf32>
    %34 = arith.addf %27, %33 : vector<32x64xf32>
    %c0_31 = arith.constant 0 : index
    %c0_32 = arith.constant 0 : index
    %35 = vector.load %arg7[%c0_31, %c0_32] : memref<32x64xf32, #tpu.memory_space<vmem>>, vector<32x64xf32>
    tpu.vector_store %arg7[%c0_31, %c0_32], %34 {strides = array<i32>} : memref<32x64xf32, #tpu.memory_space<vmem>>, vector<32x64xf32>,
    %c0_33 = arith.constant 0 : index
    %c0_34 = arith.constant 0 : index
    %c3 = arith.constant 3 : index
    %c0_35 = arith.constant 0 : index
    %36 = vector.load %arg3[%c0_33, %c0_34, %c3, %c0_35] : memref<1x1x38x4xbf16, #tpu.memory_space<vmem>>, vector<1x1x32x4xbf16>
    %37 = vector.shape_cast %36 : vector<1x1x32x4xbf16> to vector<32x4xbf16>
    %c0_36 = arith.constant 0 : index
    %c0_37 = arith.constant 0 : index
    %38 = vector.load %arg7[%c0_36, %c0_37] : memref<32x64xf32, #tpu.memory_space<vmem>>, vector<32x64xf32>
    %c7_i32_38 = arith.constant 7 : i32
    %39 = arith.muli %arg2, %c7_i32_38 : i32
    %c3_i32 = arith.constant 3 : i32
    %40 = arith.addi %39, %c3_i32 : i32
    %41 = arith.index_cast %40 : i32 to index
    %c0_39 = arith.constant 0 : index
    %c0_40 = arith.constant 0 : index
    %42 = vector.load %arg4[%41, %c0_39, %c0_40] : memref<49x4x64xbf16, #tpu.memory_space<vmem>>, vector<1x4x64xbf16>
    %43 = vector.shape_cast %42 : vector<1x4x64xbf16> to vector<4x64xbf16>
    %cst_41 = arith.constant dense<0.000000e+00> : vector<32x64xf32>
    %44 = tpu.matmul %37, %43, %cst_41 {dimension_numbers = #tpu.dot_dimension_numbers<[1], [0], [0], [1], [0, 0, 1, 1], [], []>} : vector<32x4xbf16>, vector<4x64xbf16>, vector<32x64xf32> -> vector<32x64xf32>
    %45 = arith.addf %38, %44 : vector<32x64xf32>
    %c0_42 = arith.constant 0 : index
    %c0_43 = arith.constant 0 : index
    %46 = vector.load %arg7[%c0_42, %c0_43] : memref<32x64xf32, #tpu.memory_space<vmem>>, vector<32x64xf32>
    tpu.vector_store %arg7[%c0_42, %c0_43], %45 {strides = array<i32>} : memref<32x64xf32, #tpu.memory_space<vmem>>, vector<32x64xf32>,
    %c0_44 = arith.constant 0 : index
    %c0_45 = arith.constant 0 : index
    %c4 = arith.constant 4 : index
    %c0_46 = arith.constant 0 : index
    %47 = vector.load %arg3[%c0_44, %c0_45, %c4, %c0_46] : memref<1x1x38x4xbf16, #tpu.memory_space<vmem>>, vector<1x1x32x4xbf16>
    %48 = vector.shape_cast %47 : vector<1x1x32x4xbf16> to vector<32x4xbf16>
    %c0_47 = arith.constant 0 : index
    %c0_48 = arith.constant 0 : index
    %49 = vector.load %arg7[%c0_47, %c0_48] : memref<32x64xf32, #tpu.memory_space<vmem>>, vector<32x64xf32>
    %c7_i32_49 = arith.constant 7 : i32
    %50 = arith.muli %arg2, %c7_i32_49 : i32
    %c4_i32 = arith.constant 4 : i32
    %51 = arith.addi %50, %c4_i32 : i32
    %52 = arith.index_cast %51 : i32 to index
    %c0_50 = arith.constant 0 : index
    %c0_51 = arith.constant 0 : index
    %53 = vector.load %arg4[%52, %c0_50, %c0_51] : memref<49x4x64xbf16, #tpu.memory_space<vmem>>, vector<1x4x64xbf16>
    %54 = vector.shape_cast %53 : vector<1x4x64xbf16> to vector<4x64xbf16>
    %cst_52 = arith.constant dense<0.000000e+00> : vector<32x64xf32>
    %55 = tpu.matmul %48, %54, %cst_52 {dimension_numbers = #tpu.dot_dimension_numbers<[1], [0], [0], [1], [0, 0, 1, 1], [], []>} : vector<32x4xbf16>, vector<4x64xbf16>, vector<32x64xf32> -> vector<32x64xf32>
    %56 = arith.addf %49, %55 : vector<32x64xf32>
    %c0_53 = arith.constant 0 : index
    %c0_54 = arith.constant 0 : index
    %57 = vector.load %arg7[%c0_53, %c0_54] : memref<32x64xf32, #tpu.memory_space<vmem>>, vector<32x64xf32>
    tpu.vector_store %arg7[%c0_53, %c0_54], %56 {strides = array<i32>} : memref<32x64xf32, #tpu.memory_space<vmem>>, vector<32x64xf32>,
    %c0_55 = arith.constant 0 : index
    %c0_56 = arith.constant 0 : index
    %c5 = arith.constant 5 : index
    %c0_57 = arith.constant 0 : index
    %58 = vector.load %arg3[%c0_55, %c0_56, %c5, %c0_57] : memref<1x1x38x4xbf16, #tpu.memory_space<vmem>>, vector<1x1x32x4xbf16>
    %59 = vector.shape_cast %58 : vector<1x1x32x4xbf16> to vector<32x4xbf16>
    %c0_58 = arith.constant 0 : index
    %c0_59 = arith.constant 0 : index
    %60 = vector.load %arg7[%c0_58, %c0_59] : memref<32x64xf32, #tpu.memory_space<vmem>>, vector<32x64xf32>
    %c7_i32_60 = arith.constant 7 : i32
    %61 = arith.muli %arg2, %c7_i32_60 : i32
    %c5_i32 = arith.constant 5 : i32
    %62 = arith.addi %61, %c5_i32 : i32
    %63 = arith.index_cast %62 : i32 to index
    %c0_61 = arith.constant 0 : index
    %c0_62 = arith.constant 0 : index
    %64 = vector.load %arg4[%63, %c0_61, %c0_62] : memref<49x4x64xbf16, #tpu.memory_space<vmem>>, vector<1x4x64xbf16>
    %65 = vector.shape_cast %64 : vector<1x4x64xbf16> to vector<4x64xbf16>
    %cst_63 = arith.constant dense<0.000000e+00> : vector<32x64xf32>
    %66 = tpu.matmul %59, %65, %cst_63 {dimension_numbers = #tpu.dot_dimension_numbers<[1], [0], [0], [1], [0, 0, 1, 1], [], []>} : vector<32x4xbf16>, vector<4x64xbf16>, vector<32x64xf32> -> vector<32x64xf32>
    %67 = arith.addf %60, %66 : vector<32x64xf32>
    %c0_64 = arith.constant 0 : index
    %c0_65 = arith.constant 0 : index
    %68 = vector.load %arg7[%c0_64, %c0_65] : memref<32x64xf32, #tpu.memory_space<vmem>>, vector<32x64xf32>
    tpu.vector_store %arg7[%c0_64, %c0_65], %67 {strides = array<i32>} : memref<32x64xf32, #tpu.memory_space<vmem>>, vector<32x64xf32>,
    %c0_66 = arith.constant 0 : index
    %c0_67 = arith.constant 0 : index
    %c6 = arith.constant 6 : index
    %c0_68 = arith.constant 0 : index
    %69 = vector.load %arg3[%c0_66, %c0_67, %c6, %c0_68] : memref<1x1x38x4xbf16, #tpu.memory_space<vmem>>, vector<1x1x32x4xbf16>
    %70 = vector.shape_cast %69 : vector<1x1x32x4xbf16> to vector<32x4xbf16>
    %c0_69 = arith.constant 0 : index
    %c0_70 = arith.constant 0 : index
    %71 = vector.load %arg7[%c0_69, %c0_70] : memref<32x64xf32, #tpu.memory_space<vmem>>, vector<32x64xf32>
    %c7_i32_71 = arith.constant 7 : i32
    %72 = arith.muli %arg2, %c7_i32_71 : i32
    %c6_i32 = arith.constant 6 : i32
    %73 = arith.addi %72, %c6_i32 : i32
    %74 = arith.index_cast %73 : i32 to index
    %c0_72 = arith.constant 0 : index
    %c0_73 = arith.constant 0 : index
    %75 = vector.load %arg4[%74, %c0_72, %c0_73] : memref<49x4x64xbf16, #tpu.memory_space<vmem>>, vector<1x4x64xbf16>
    %76 = vector.shape_cast %75 : vector<1x4x64xbf16> to vector<4x64xbf16>
    %cst_74 = arith.constant dense<0.000000e+00> : vector<32x64xf32>
    %77 = tpu.matmul %70, %76, %cst_74 {dimension_numbers = #tpu.dot_dimension_numbers<[1], [0], [0], [1], [0, 0, 1, 1], [], []>} : vector<32x4xbf16>, vector<4x64xbf16>, vector<32x64xf32> -> vector<32x64xf32>
    %78 = arith.addf %71, %77 : vector<32x64xf32>
    %c0_75 = arith.constant 0 : index
    %c0_76 = arith.constant 0 : index
    %79 = vector.load %arg7[%c0_75, %c0_76] : memref<32x64xf32, #tpu.memory_space<vmem>>, vector<32x64xf32>
    tpu.vector_store %arg7[%c0_75, %c0_76], %78 {strides = array<i32>} : memref<32x64xf32, #tpu.memory_space<vmem>>, vector<32x64xf32>,
    %c6_i32_77 = arith.constant 6 : i32
    %80 = arith.cmpi eq, %arg2, %c6_i32_77 : i32
    %81 = arith.extui %80 : i1 to i32
    %c0_i32_78 = arith.constant 0 : i32
    %82 = arith.cmpi ne, %81, %c0_i32_78 : i32
    scf.if %82 {
      %c0_79 = arith.constant 0 : index
      %c0_80 = arith.constant 0 : index
      %83 = vector.load %arg7[%c0_79, %c0_80] : memref<32x64xf32, #tpu.memory_space<vmem>>, vector<32x64xf32>
      %c0_81 = arith.constant 0 : index
      %c0_82 = arith.constant 0 : index
      %84 = vector.load %arg5[%c0_81, %c0_82] : memref<1x64xf32, #tpu.memory_space<vmem>>, vector<1x64xf32>
      %85 = vector.broadcast %84 : vector<1x64xf32> to vector<32x64xf32>
      %86 = arith.addf %83, %85 : vector<32x64xf32>
      %c0_83 = arith.constant 0 : index
      %c0_84 = arith.constant 0 : index
      %c0_85 = arith.constant 0 : index
      %c0_86 = arith.constant 0 : index
      %87 = vector.load %arg6[%c0_83, %c0_84, %c0_85, %c0_86] : memref<1x1x32x64xf32, #tpu.memory_space<vmem>>, vector<1x1x32x64xf32>
      %88 = vector.shape_cast %87 : vector<1x1x32x64xf32> to vector<32x64xf32>
      %89 = vector.shape_cast %86 : vector<32x64xf32> to vector<1x1x32x64xf32>
      tpu.vector_store %arg6[%c0_83, %c0_84, %c0_85, %c0_86], %89 {strides = array<i32>} : memref<1x1x32x64xf32, #tpu.memory_space<vmem>>, vector<1x1x32x64xf32>,
    } else {
    }
    return
  }
  func.func @transform_0(%arg0: i32, %arg1: i32, %arg2: i32) -> (i32, i32, i32, i32) {
    %c1_i32 = arith.constant 1 : i32
    %0 = arith.muli %arg2, %c1_i32 : i32
    %1 = arith.addi %arg1, %0 : i32
    %c0_i32 = arith.constant 0 : i32
    %c0_i32_0 = arith.constant 0 : i32
    %c0_i32_1 = arith.constant 0 : i32
    return %arg0, %1, %c0_i32, %c0_i32_0 : i32, i32, i32, i32
  }
  func.func @transform_1(%arg0: i32, %arg1: i32, %arg2: i32) -> (i32, i32, i32) {
    %c0_i32 = arith.constant 0 : i32
    %c0_i32_0 = arith.constant 0 : i32
    %c0_i32_1 = arith.constant 0 : i32
    %c0_i32_2 = arith.constant 0 : i32
    return %c0_i32, %c0_i32_0, %c0_i32_1 : i32, i32, i32
  }
  func.func @transform_2(%arg0: i32, %arg1: i32, %arg2: i32) -> (i32, i32) {
    %c0_i32 = arith.constant 0 : i32
    %c0_i32_0 = arith.constant 0 : i32
    %c0_i32_1 = arith.constant 0 : i32
    return %c0_i32, %c0_i32_0 : i32, i32
  }
  func.func @transform_3(%arg0: i32, %arg1: i32, %arg2: i32) -> (i32, i32, i32, i32) {
    %c0_i32 = arith.constant 0 : i32
    %c0_i32_0 = arith.constant 0 : i32
    %c0_i32_1 = arith.constant 0 : i32
    return %arg0, %arg1, %c0_i32, %c0_i32_0 : i32, i32, i32, i32
  }
}

</mosaic_0001>

<bundles_post_ra>
// kernel: conv2d.1
= control target key start
LH: loop header
LB: loop body
LE: loop exit
PB: predicated region body
PF: predicated region fallthrough
CT: control target
= control target key end

     0   :  { %8 = vsyncpa [#allocation4], 0  ;;  %s1457_s0 = inlined_call_operand.vmem [shape: bf16[1,38,38,4], index: 0, kind: input, shape index: {}]   ;;  %s1458_s1 = inlined_call_operand.vmem [shape: bf16[49,4,64], index: 1, kind: input, shape index: {}]   ;;  %s1459_s2 = inlined_call_operand.vmem [shape: f32[1,64], index: 2, kind: input, shape index: {}]   ;;  %s1460_s3 = inlined_call_operand.hbm [shape: f32[1,32,32,64], index: 3, kind: output, shape index: {}]  }
   0x1   :  { %10 = vsyncpa [#allocation4 + $0x1], 0  ;;  %s1208_s12 = smov 0   ;;  %s1210_s13 = smov 0  }
   0x2   :  { %s1212_s14 = smov 0   ;;  %s1214_s15 = smov 0  }
   0x3   :  { %s1216_s16 = smov 0   ;;  %s1218_s17 = smov 0  }
   0x4   :  { %s1220_s18 = smov 0   ;;  %s1222_s19 = smov 0  }
   0x5 LB: > { %s899_s20 = sadd.s32 4294967295, %s1183_s19   ;;  %s900_s21 = sadd.s32 4294967294, %s1183_s19   ;;  %s1183_s19 = sphi %s1222_s19, %s16_s19   ;;  %s1179_s18 = sphi %s1220_s18, %s1469_s18   ;;  %s1175_s17 = sphi %s1218_s17, %s1468_s17   ;;  %s1171_s16 = sphi %s1216_s16, %s1467_s16   ;;  %s1167_s15 = sphi %s1214_s15, %s1466_s15   ;;  %s1163_s14 = sphi %s1212_s14, %s1465_s14   ;;  %s1159_s13 = sphi %s1210_s13, %s1464_s13   ;;  %s1155_s12 = sphi %s1208_s12, %s1463_s12  }
   0x6   : > { %s28_s22 = sadd.s32 1, %s1175_s17  ;;  %s31_s23 = sadd.s32 1, %s1179_s18 }
   0x7   : > { %p29_p0 = scmp.ge.s32.totalorder %s28_s22, 7  ;;  %p126_p1 = scmp.ne.s32.totalorder %s1163_s14, %s1159_s13 }
   0x8   : > { %p127_p2 = scmp.eq.s32.totalorder %s899_s20, 223  ;;  %p132_p4 = scmp.ne.s32.totalorder %s1159_s13, %s1155_s12 }
   0x9   : > { %s1471_s22 = smov (%p29_p0, %s28_s22), 0  ;;  %s1473_s23 = smov (!%p29_p0, %s31_s23), %s1179_s18 }
   0xa   : > { %p1257_p3 = por %p127_p2, %p126_p1  ;;  %p33_p5 = scmp.ge.s32.totalorder %s1473_s23, 32 }
   0xb   : > { %p133_p6 = scmp.eq.s32.totalorder %s900_s21, 223  ;;  %p903_p7 = scmp.ge.s32.totalorder %s1183_s19, 1 }
   0xc   : > { %p171_p8 = scmp.lt.s32.totalorder %s1183_s19, 225  ;;  %s1475_s23 = smov (%p33_p5, %s1473_s23), 0 }
   0xd   : > { %p1267_p9 = por %p133_p6, %p132_p4  ;;  %s112_s26 = ssub.s32 %s1179_s18, %s1475_s23 }
   0xe   : > { %p172_p10 = pnand %p903_p7, %p171_p8  ;;  %s116_s27 = sadd.s32 1, %s1163_s14 }
   0xf   : > { %p114_p11 = scmp.eq.s32.totalorder %s112_s26, 0  ;;  %s197_s29 = sand.u32 (!%p172_p10), 1, %s1159_s13  }
  0x10   : > { %175 = sbr.rel (%p172_p10) target bundleno = 272 (0x110), region = 32  ;;  %s200_s30 = sadd.s32 (!%p172_p10), %s1167_s15, %s1171_s16 }
  0x11   : > { %s1275_s28 = scalar_select %p114_p11, %s1163_s14, %s116_s27  }
  0x12   : > { %s904_s4 = sshll.u32 (!%p172_p10), %s197_s29, 5  ;;  %p203_p12 = scmp.lt.s32.totalorder (!%p172_p10), %s200_s30, 37 }
  0x13   : > { %s1287_s9 = scalar_lea.vmem (!%p172_p10), [#allocation3], %s904_s4  ;;  %p906_p13 = scmp.ne.s32.totalorder (!%p172_p10), %s1167_s15, 0 }
  0x15   : > { %s1477_s30 = smov (!%p203_p12, %s200_s30), 37  ;;  %215 = sbr.rel (%p906_p13) target bundleno = 31 (0x1f), region = 36 }
  0x16   : > { %s1013_s5 = smul.u32 20, %s1477_s30 }
  0x18   : > { %s1285_s8 = scalar_lea.vmem %s1457_s0, %s1013_s5 }
  0x1a   : > { %vm216_vm0 = vcmask 523264   ;;  %v1185_v0 = vmov 0.0  }
  0x1b   : > { %217 = vst.msk [vmem:[#allocation2] sm:$0xff] %vm216_vm0, %v1185_v0 }
  0x1c   : > { %218 = vst.msk [vmem:[#allocation2 + $0x8] sm:$0xff] %vm216_vm0, %v1185_v0 }
  0x1d   : > { %219 = vst.msk [vmem:[#allocation2 + $0x10] sm:$0xff] %vm216_vm0, %v1185_v0 }
  0x1e   : > { %220 = vst.msk [vmem:[#allocation2 + $0x18] sm:$0xff] %vm216_vm0, %v1185_v0 }
  0x1f PF: > { %s998_s10 = smul.u32 14, %s1167_s15  ;;  %v1292_v1 = vld [vmem:[%s1285_s8 + $0x8] sm:$0xff]  ;;  %vm250_vm1 = vcmask 1041408   ;;  %v934_v2 = vld [vmem:[%s1285_s8] sm:$0xe]  ;;  %vm243_vm2 = vcmask 31744  }
  0x20   : > { %v1001_v3 = vld [vmem:[%s1285_s8] sm:$0xf0]  ;;  %v997_v6 = vld [vmem:[%s1285_s8 + $0x8] sm:$0xff]  ;;  %vm391_vm3 = vcmask 1046528   ;;  %v393_v8 = vrot.slane %v1292_v1, 1  ;;  %vm548_vm6 = vcmask 1045504  }
  0x21   : > { %v999_v4 = vld [vmem:[%s1285_s8] sm:$0xff]  ;;  %s1300_s21 = scalar_lea.vmem %s1458_s1, %s998_s10  ;;  %v935_v7 = vor.u32 %v1001_v3, %v934_v2  ;;  %v1306_v9 = vld [vmem:[%s1285_s8 + $0x8] sm:$0xff]  ;;  %v369_v23 = vld [vmem:[%s1285_s8 + $0x10] sm:$0x1]  ;;  %vm308_vm4 = vsmask.f32 7424 }
  0x22   : > { %v996_v5 = vld [vmem:[%s1285_s8] sm:$0xff]  ;;  %v310_v19 = vshrl.u32 %v999_v4, 16  ;;  %v312_v20 = vshll.u32 %v999_v4, 16  ;;  %v317_v21 = vshll.u32 %v1306_v9, 16  ;;  %v967_v22 = vld [vmem:[%s1300_s21 + $0xa] sm:$0x3]  ;;  %v387_v40 = vunpack.c.l.b16 %v369_v23 }
  0x23   : > { %v232_v10 = vld [vmem:[%s1300_s21] sm:$0x3]  ;;  %v931_v11 = vld [vmem:[%s1300_s21 + $0x4] sm:$0x3]  ;;  %v919_v12 = vld [vmem:[%s1300_s21 + $0x2] sm:$0x3] }
  0x24   : > { %v252_v13 = vsel %vm250_vm1, %v232_v10, 0  ;;  %v404_v14 = vsel %vm250_vm1, %v931_v11, 0  ;;  %v336_v15 = vsel %vm250_vm1, %v919_v12, 0  ;;  %v392_v16 = vrot.slane %v935_v7, 1  ;;  %v943_v17 = vld [vmem:[%s1300_s21 + $0x6] sm:$0x3] }
  0x25   : > { %261 = vmatpush.bf16.msra.mxu0 %v252_v13  ;;  %1012 = vmatpush.bf16.msra.mxu3 %v252_v13  ;;  %v493_v18 = vsel %vm250_vm1, %v943_v17, 0  ;;  %v650_v25 = vsel %vm250_vm1, %v967_v22, 0  ;;  %v979_v26 = vld [vmem:[%s1300_s21 + $0xc] sm:$0x3]  ;;  %v946_v27 = vld [vmem:[%s1285_s8] sm:$0xe]  ;;  %v390_v54 = vpack.c.b16 %v387_v40, %v387_v40 }
  0x26   : > { %413 = vmatpush.bf16.msra.mxu2 %v404_v14  ;;  %345 = vmatpush.bf16.msra.mxu1 %v336_v15  ;;  %v394_v24 = vsel %vm391_vm3, %v392_v16, %v393_v8  ;;  %v1004_v28 = vld [vmem:[%s1285_s8 + $0x8] sm:$0xff]  ;;  %v314_v29 = vrot.slane %v312_v20, 1  ;;  %v319_v30 = vrot.slane %v317_v21, 1  ;;  %v718_v31 = vsel %vm250_vm1, %v979_v26, 0  ;;  %v1003_v32 = vld [vmem:[%s1285_s8] sm:$0xf0] }
  0x27   : > { %v947_v33 = vor.u32 %v1003_v32, %v946_v27  ;;  %v469_v34 = vshrl.u32 %v1004_v28, 16  ;;  %v955_v35 = vld [vmem:[%s1300_s21 + $0x8] sm:$0x3]  ;;  %v472_v37 = vshll.u32 %v1004_v28, 16  ;;  %v286_v39 = vld [vmem:[%s1285_s8 + $0x10] sm:$0x1] }
  0x28   : > { %916 = vmatmul.msk.bf16.vlgmr.msra.gmra.mxu0 %vm243_vm2, %v996_v5  ;;  %917 = vmatmul.msk.bf16.vlgmr.msra.gmra.mxu3 %vm243_vm2, %v997_v6  ;;  %v315_v36 = vor.u32 %v314_v29, %v310_v19  ;;  %v561_v38 = vsel %vm250_vm1, %v955_v35, 0  ;;  %v958_v43 = vld [vmem:[%s1285_s8] sm:$0xc]  ;;  %v1005_v44 = vld [vmem:[%s1285_s8] sm:$0xf0]  ;;  %v304_v46 = vunpack.c.l.b16 %v286_v39  ;;  %v1006_v49 = vld [vmem:[%s1285_s8 + $0x8] sm:$0xff] }
  0x29   : > { %502 = vmatpush.bf16.msrb.mxu3 %v493_v18  ;;  %940 = vmatmul.msk.bf16.vlgmr.msra.gmra.mxu2 %vm243_vm2, %v394_v24  ;;  %v461_v41 = vshrl.u32 %v947_v33, 16  ;;  %v464_v42 = vshll.u32 %v947_v33, 16  ;;  %v471_v47 = vrot.slane %v469_v34, 1  ;;  %v474_v48 = vrot.slane %v472_v37, 2  ;;  %v437_v55 = vld [vmem:[%s1285_s8 + $0x10] sm:$0x3] }
  0x2a   : > { %659 = vmatpush.bf16.msrb.mxu1 %v650_v25  ;;  %727 = vmatpush.bf16.msrb.mxu2 %v718_v31  ;;  %v320_v45 = vsel %vm308_vm4, %v315_v36, %v319_v30  ;;  %v307_v52 = vpack.c.b16 %v304_v46, %v304_v46  ;;  %v959_v53 = vor.u32 %v1005_v44, %v958_v43  ;;  %v321_v57 = vshrl.u32 %v1306_v9, 16  ;;  %v970_v6 = vld [vmem:[%s1285_s8] sm:$0xc]  ;;  %v1007_v7 = vld [vmem:[%s1285_s8] sm:$0xf0]  ;;  %v1008_v11 = vld [vmem:[%s1285_s8 + $0x8] sm:$0xff] }
  0x2b   : > { %570 = vmatpush.bf16.msrb.mxu0 %v561_v38  ;;  %928 = vmatmul.msk.bf16.vlgmr.msra.gmra.mxu1 %vm243_vm2, %v320_v45  ;;  %v463_v50 = vrot.slane %v461_v41, 1  ;;  %v466_v51 = vrot.slane %v464_v42, 2  ;;  %v475_v56 = vor.u32 %v474_v48, %v471_v47  ;;  %v550_v58 = vrot.slane %v1006_v49, 2  ;;  %v526_v10 = vld [vmem:[%s1285_s8 + $0x10] sm:$0x3]  ;;  %v1010_v24 = vld [vmem:[%s1285_s8 + $0x8] sm:$0xff] }
  0x2c   : > { %v325_v60 = vshll.u32 %v307_v52, 16  ;;  %v549_v61 = vrot.slane %v959_v53, 2  ;;  %v455_v62 = vunpack.c.l.b16 %v437_v55  ;;  %v395_v63 = vrot.slane %v390_v54, 1  ;;  %v982_v17 = vld [vmem:[%s1285_s8] sm:$0x8]  ;;  %p990_p0 = scmp.ne.s32.totalorder %s1167_s15, 6 }
  0x2d   : > { %v467_v59 = vor.u32 %v466_v51, %v463_v50  ;;  %vm459_vm5 = vsmask.f32 6400  ;;  %v323_v0 = vor.u32 %v321_v57, %v319_v30  ;;  %v971_v12 = vor.u32 %v1007_v7, %v970_v6  ;;  %v1009_v18 = vld [vmem:[%s1285_s8] sm:$0xf0]  ;;  %v594_v34 = vld [vmem:[%s1285_s8 + $0x10] sm:$0x7] }
  0x2e   : > { %v327_v3 = vrot.slane %v325_v60, 1  ;;  %v551_v4 = vsel %vm548_vm6, %v549_v61, %v550_v58  ;;  %v458_v5 = vpack.c.b16 %v455_v62, %v455_v62  ;;  %v396_v9 = vsel %vm391_vm3, %v393_v8, %v395_v63  ;;  %v683_v41 = vld [vmem:[%s1285_s8 + $0x10] sm:$0x7]  ;;  %v225_v54 = vld [vmem:[#allocation2] sm:$0xff]  ;;  %v226_v60 = vld [vmem:[#allocation2 + $0x8] sm:$0xff] }
  0x2f   : > { %v476_v2 = vsel %vm459_vm5, %v467_v59, %v475_v56  ;;  %v544_v16 = vunpack.c.l.b16 %v526_v10  ;;  %v618_v1 = vshrl.u32 %v971_v12, 16  ;;  %v626_v8 = vshrl.u32 %v1008_v11, 16 }
  0x30   : > { %v328_v13 = vsel %vm308_vm4, %v323_v0, %v327_v3  ;;  %v478_v14 = vshrl.u32 %v458_v5, 16  ;;  %v481_v15 = vshll.u32 %v458_v5, 16  ;;  %v629_v19 = vshll.u32 %v1008_v11, 16  ;;  %v228_v5 = vld [vmem:[#allocation2 + $0x18] sm:$0xff] }
  0x31   : > { %v621_v22 = vshll.u32 %v971_v12, 16  ;;  %v547_v23 = vpack.c.b16 %v544_v16, %v544_v16  ;;  %v983_v25 = vor.u32 %v1009_v18, %v982_v17  ;;  %v628_v26 = vrot.slane %v626_v8, 2 }
  0x32   : > { %v480_v20 = vrot.slane %v478_v14, 1  ;;  %v483_v21 = vrot.slane %v481_v15, 2  ;;  %v631_v27 = vrot.slane %v629_v19, 3  ;;  %v620_v29 = vrot.slane %v618_v1, 2 }
  0x33   : > { %v623_v30 = vrot.slane %v621_v22, 3  ;;  %v552_v31 = vrot.slane %v547_v23, 2  ;;  %v706_v32 = vrot.slane %v983_v25, 3  ;;  %v707_v33 = vrot.slane %v1010_v24, 3 }
  0x34   : > { %v484_v28 = vor.u32 %v483_v21, %v480_v20  ;;  %vm705_vm7 = vcmask 1044480   ;;  %v632_v35 = vor.u32 %v631_v27, %v628_v26  ;;  %v612_v39 = vunpack.c.l.b16 %v594_v34 }
  0x35   : > { %v624_v37 = vor.u32 %v623_v30, %v620_v29  ;;  %v553_v38 = vsel %vm548_vm6, %v550_v58, %v552_v31  ;;  %vm616_vm8 = vsmask.f32 5376  ;;  %v708_v40 = vsel %vm705_vm7, %v706_v32, %v707_v33  ;;  %v227_v58 = vld [vmem:[#allocation2 + $0x10] sm:$0xff] }
  0x36   : > { %v485_v36 = vsel %vm459_vm5, %v475_v56, %v484_v28  ;;  %v615_v43 = vpack.c.b16 %v612_v39, %v612_v39  ;;  %v701_v44 = vunpack.c.l.b16 %v683_v41  ;;  %vm277_vm9 = vcmask 523264  }
  0x37   : > { %v633_v42 = vsel %vm616_vm8, %v624_v37, %v632_v35 }
  0x38   : > { %952 = vmatmul.msk.bf16.vlgmr.msrb.gmra.mxu3 %vm243_vm2, %v476_v2  ;;  %964 = vmatmul.msk.bf16.vlgmr.msrb.gmra.mxu0 %vm243_vm2, %v551_v4  ;;  %v635_v45 = vshrl.u32 %v615_v43, 16  ;;  %v638_v46 = vshll.u32 %v615_v43, 16  ;;  %v704_v47 = vpack.c.b16 %v701_v44, %v701_v44 }
  0x39   : > { %941 = vmatmul.msk.bf16.gmra.mxu2 %vm243_vm2, %v396_v9 }
  0x3a   : > { %v637_v48 = vrot.slane %v635_v45, 2  ;;  %v640_v49 = vrot.slane %v638_v46, 3  ;;  %v709_v50 = vrot.slane %v704_v47, 3 }
  0x3b   : > { %929 = vmatmul.msk.bf16.gmra.mxu1 %vm243_vm2, %v328_v13 }
  0x3c   : > { %v641_v51 = vor.u32 %v640_v49, %v637_v48  ;;  %v710_v52 = vsel %vm705_vm7, %v707_v33, %v709_v50 }
  0x3e   : > { %v642_v53 = vsel %vm616_vm8, %v632_v35, %v641_v51 }
  0x48   : > { %953 = vmatmul.msk.bf16.gmra.mxu3 %vm243_vm2, %v485_v36  ;;  %965 = vmatmul.msk.bf16.gmra.mxu0 %vm243_vm2, %v553_v38 }
  0x49   : > { %988 = vmatmul.msk.bf16.vlgmr.msrb.gmra.mxu2 %vm243_vm2, %v708_v40 }
  0x4b   : > { %976 = vmatmul.msk.bf16.vlgmr.msrb.gmra.mxu1 %vm243_vm2, %v633_v42 }
  0x59   : > { %989 = vmatmul.msk.bf16.gmra.mxu2 %vm243_vm2, %v710_v52 }
  0x5b   : > { %977 = vmatmul.msk.bf16.gmra.mxu1 %vm243_vm2, %v642_v53 }
  0xa5   : > { %v263_v55 = vpop.f32.mrf.mxu0 }
  0xa6   : > { %v273_v56 = vadd.f32 %v263_v55, %v225_v54 }
  0xa8   : > { %278 = vst.msk [vmem:[#allocation2] sm:$0xff] %vm277_vm9, %v273_v56  ;;  %v347_v57 = vpop.f32.mrf.mxu1 }
  0xab   : > { %v268_v59 = vpop.f32.mrf.mxu3 }
  0xac   : > { %v275_v61 = vadd.f32 %v268_v59, %v227_v58  ;;  %v415_v63 = vpop.f32.mrf.mxu2 }
  0xad   : > { %v265_v62 = vpop.f32.mrf.mxu0 }
  0xae   : > { %280 = vst.msk [vmem:[#allocation2 + $0x10] sm:$0xff] %vm277_vm9, %v275_v61  ;;  %v274_v0 = vadd.f32 %v265_v62, %v226_v60 }
  0xaf   : > { %v287_v2 = vld [vmem:[#allocation2] sm:$0xff] }
  0xb0   : > { %v357_v3 = vadd.f32 %v347_v57, %v287_v2  ;;  %279 = vst.msk [vmem:[#allocation2 + $0x8] sm:$0xff] %vm277_vm9, %v274_v0  ;;  %v349_v4 = vpop.f32.mrf.mxu1 }
  0xb2   : > { %361 = vst.msk [vmem:[#allocation2] sm:$0xff] %vm277_vm9, %v357_v3 }
  0xb3   : > { %v270_v6 = vpop.f32.mrf.mxu3 }
  0xb4   : > { %v276_v7 = vadd.f32 %v270_v6, %v228_v5  ;;  %v417_v12 = vpop.f32.mrf.mxu2 }
  0xb5   : > { %v289_v10 = vld [vmem:[#allocation2 + $0x10] sm:$0xff]  ;;  %v572_v8 = vpop.f32.mrf.mxu0 }
  0xb6   : > { %281 = vst.msk [vmem:[#allocation2 + $0x18] sm:$0xff] %vm277_vm9, %v276_v7 }
  0xb7   : > { %v288_v9 = vld [vmem:[#allocation2 + $0x8] sm:$0xff] }
  0xb8   : > { %v358_v11 = vadd.f32 %v349_v4, %v288_v9  ;;  %v352_v14 = vpop.f32.mrf.mxu1 }
  0xb9   : > { %v370_v13 = vld [vmem:[#allocation2] sm:$0xff]  ;;  %v359_v16 = vadd.f32 %v352_v14, %v289_v10 }
  0xba   : > { %v425_v15 = vadd.f32 %v415_v63, %v370_v13  ;;  %362 = vst.msk [vmem:[#allocation2 + $0x8] sm:$0xff] %vm277_vm9, %v358_v11 }
  0xbb   : > { %v504_v17 = vpop.f32.mrf.mxu3  ;;  %363 = vst.msk [vmem:[#allocation2 + $0x10] sm:$0xff] %vm277_vm9, %v359_v16 }
  0xbc   : > { %429 = vst.msk [vmem:[#allocation2] sm:$0xff] %vm277_vm9, %v425_v15  ;;  %v420_v21 = vpop.f32.mrf.mxu2 }
  0xbd   : > { %v290_v18 = vld [vmem:[#allocation2 + $0x18] sm:$0xff]  ;;  %v574_v29 = vpop.f32.mrf.mxu0 }
  0xc0   : > { %v354_v19 = vpop.f32.mrf.mxu1 }
  0xc1   : > { %v371_v1 = vld [vmem:[#allocation2 + $0x8] sm:$0xff]  ;;  %v360_v22 = vadd.f32 %v354_v19, %v290_v18 }
  0xc2   : > { %v426_v20 = vadd.f32 %v417_v12, %v371_v1  ;;  %v372_v25 = vld [vmem:[#allocation2 + $0x10] sm:$0xff] }
  0xc3   : > { %v438_v23 = vld [vmem:[#allocation2] sm:$0xff]  ;;  %v506_v24 = vpop.f32.mrf.mxu3  ;;  %v427_v27 = vadd.f32 %v420_v21, %v372_v25  ;;  %364 = vst.msk [vmem:[#allocation2 + $0x18] sm:$0xff] %vm277_vm9, %v360_v22 }
  0xc4   : > { %430 = vst.msk [vmem:[#allocation2 + $0x8] sm:$0xff] %vm277_vm9, %v426_v20  ;;  %v514_v26 = vadd.f32 %v504_v17, %v438_v23  ;;  %v422_v32 = vpop.f32.mrf.mxu2 }
  0xc5   : > { %431 = vst.msk [vmem:[#allocation2 + $0x10] sm:$0xff] %vm277_vm9, %v427_v27  ;;  %v577_v42 = vpop.f32.mrf.mxu0 }
  0xc6   : > { %518 = vst.msk [vmem:[#allocation2] sm:$0xff] %vm277_vm9, %v514_v26 }
  0xc8   : > { %v661_v34 = vpop.f32.mrf.mxu1 }
  0xca   : > { %v373_v31 = vld [vmem:[#allocation2 + $0x18] sm:$0xff] }
  0xcb   : > { %v439_v28 = vld [vmem:[#allocation2 + $0x8] sm:$0xff]  ;;  %v509_v30 = vpop.f32.mrf.mxu3  ;;  %v428_v36 = vadd.f32 %v422_v32, %v373_v31 }
  0xcc   : > { %v515_v33 = vadd.f32 %v506_v24, %v439_v28  ;;  %v440_v38 = vld [vmem:[#allocation2 + $0x10] sm:$0xff]  ;;  %v729_v45 = vpop.f32.mrf.mxu2 }
  0xcd   : > { %v527_v35 = vld [vmem:[#allocation2] sm:$0xff]  ;;  %432 = vst.msk [vmem:[#allocation2 + $0x18] sm:$0xff] %vm277_vm9, %v428_v36  ;;  %v516_v39 = vadd.f32 %v509_v30, %v440_v38  ;;  %v579_v53 = vpop.f32.mrf.mxu0 }
  0xce   : > { %v582_v37 = vadd.f32 %v572_v8, %v527_v35  ;;  %519 = vst.msk [vmem:[#allocation2 + $0x8] sm:$0xff] %vm277_vm9, %v515_v33 }
  0xcf   : > { %520 = vst.msk [vmem:[#allocation2 + $0x10] sm:$0xff] %vm277_vm9, %v516_v39 }
  0xd0   : > { %586 = vst.msk [vmem:[#allocation2] sm:$0xff] %vm277_vm9, %v582_v37  ;;  %v663_v44 = vpop.f32.mrf.mxu1 }
  0xd3   : > { %v511_v40 = vpop.f32.mrf.mxu3 }
  0xd4   : > { %v441_v46 = vld [vmem:[#allocation2 + $0x18] sm:$0xff]  ;;  %v731_v57 = vpop.f32.mrf.mxu2 }
  0xd5   : > { %v528_v41 = vld [vmem:[#allocation2 + $0x8] sm:$0xff]  ;;  %v517_v48 = vadd.f32 %v511_v40, %v441_v46 }
  0xd6   : > { %v583_v43 = vadd.f32 %v574_v29, %v528_v41  ;;  %v529_v50 = vld [vmem:[#allocation2 + $0x10] sm:$0xff] }
  0xd7   : > { %v595_v47 = vld [vmem:[#allocation2] sm:$0xff]  ;;  %v584_v51 = vadd.f32 %v577_v42, %v529_v50  ;;  %521 = vst.msk [vmem:[#allocation2 + $0x18] sm:$0xff] %vm277_vm9, %v517_v48 }
  0xd8   : > { %587 = vst.msk [vmem:[#allocation2 + $0x8] sm:$0xff] %vm277_vm9, %v583_v43  ;;  %v671_v49 = vadd.f32 %v661_v34, %v595_v47  ;;  %v666_v56 = vpop.f32.mrf.mxu1 }
  0xd9   : > { %588 = vst.msk [vmem:[#allocation2 + $0x10] sm:$0xff] %vm277_vm9, %v584_v51 }
  0xda   : > { %675 = vst.msk [vmem:[#allocation2] sm:$0xff] %vm277_vm9, %v671_v49 }
  0xdc   : > { %v734_v4 = vpop.f32.mrf.mxu2 }
  0xde   : > { %v530_v55 = vld [vmem:[#allocation2 + $0x18] sm:$0xff] }
  0xdf   : > { %v596_v52 = vld [vmem:[#allocation2 + $0x8] sm:$0xff]  ;;  %v585_v59 = vadd.f32 %v579_v53, %v530_v55 }
  0xe0   : > { %v672_v54 = vadd.f32 %v663_v44, %v596_v52  ;;  %v597_v61 = vld [vmem:[#allocation2 + $0x10] sm:$0xff]  ;;  %v668_v3 = vpop.f32.mrf.mxu1 }
  0xe1   : > { %v684_v58 = vld [vmem:[#allocation2] sm:$0xff]  ;;  %589 = vst.msk [vmem:[#allocation2 + $0x18] sm:$0xff] %vm277_vm9, %v585_v59  ;;  %v673_v62 = vadd.f32 %v666_v56, %v597_v61 }
  0xe2   : > { %676 = vst.msk [vmem:[#allocation2 + $0x8] sm:$0xff] %vm277_vm9, %v672_v54  ;;  %v739_v60 = vadd.f32 %v729_v45, %v684_v58 }
  0xe3   : > { %677 = vst.msk [vmem:[#allocation2 + $0x10] sm:$0xff] %vm277_vm9, %v673_v62 }
  0xe4   : > { %743 = vst.msk [vmem:[#allocation2] sm:$0xff] %vm277_vm9, %v739_v60  ;;  %v736_v10 = vpop.f32.mrf.mxu2 }
  0xe8   : > { %v598_v2 = vld [vmem:[#allocation2 + $0x18] sm:$0xff] }
  0xe9   : > { %v685_v63 = vld [vmem:[#allocation2 + $0x8] sm:$0xff]  ;;  %v674_v5 = vadd.f32 %v668_v3, %v598_v2 }
  0xea   : > { %v740_v0 = vadd.f32 %v731_v57, %v685_v63  ;;  %v686_v6 = vld [vmem:[#allocation2 + $0x10] sm:$0xff] }
  0xeb   : > { %678 = vst.msk [vmem:[#allocation2 + $0x18] sm:$0xff] %vm277_vm9, %v674_v5  ;;  %v741_v7 = vadd.f32 %v734_v4, %v686_v6 }
  0xec   : > { %744 = vst.msk [vmem:[#allocation2 + $0x8] sm:$0xff] %vm277_vm9, %v740_v0 }
  0xed   : > { %745 = vst.msk [vmem:[#allocation2 + $0x10] sm:$0xff] %vm277_vm9, %v741_v7 }
  0xf1   : > { %750 = sbr.rel (%p990_p0) target bundleno = 256 (0x100), region = 40 }
  0xf2   : > { %v687_v9 = vld [vmem:[#allocation2 + $0x18] sm:$0xff] }
  0xf3   : > { %v742_v11 = vadd.f32 %v736_v10, %v687_v9 }
  0xf5   : > { %746 = vst.msk [vmem:[#allocation2 + $0x18] sm:$0xff] %vm277_vm9, %v742_v11 }
  0xf6   : > { %v751_v12 = vld [vmem:[#allocation2] sm:$0xff]  ;;  %v752_v14 = vld [vmem:[#allocation2 + $0x8] sm:$0xff]  ;;  %v753_v15 = vld [vmem:[#allocation2 + $0x10] sm:$0xff] }
  0xf7   : > { %v1088_v13 = vld [vmem:[%s1459_s2] ss:$0 sm:$0xff] }
  0xf8   : > { %v759_v17 = vadd.f32 %v1088_v13, %v751_v12  ;;  %v760_v18 = vadd.f32 %v1088_v13, %v752_v14  ;;  %v761_v1 = vadd.f32 %v1088_v13, %v753_v15 }
  0xfa   : > { %763 = vst.msk [vmem:[%s1287_s9] sm:$0xff] %vm277_vm9, %v759_v17 }
  0xfb   : > { %764 = vst.msk [vmem:[%s1287_s9 + $0x8] sm:$0xff] %vm277_vm9, %v760_v18 }
  0xfc   : > { %v754_v16 = vld [vmem:[#allocation2 + $0x18] sm:$0xff]  ;;  %765 = vst.msk [vmem:[%s1287_s9 + $0x10] sm:$0xff] %vm277_vm9, %v761_v1 }
  0xfd   : > { %v762_v8 = vadd.f32 %v1088_v13, %v754_v16 }
  0xff   : > { %766 = vst.msk [vmem:[%s1287_s9 + $0x18] sm:$0xff] %vm277_vm9, %v762_v8 }
 0x100 PF: > { %s1011_s15 = sshll.u32 %s1171_s16, 5  ;;  %s782_s6 = sshll.u32 %s1287_s9, 4  ;;  %s783_s6 = int_to_ptr.vmem [resolvable:$true] %s782_s6 }
 0x101   : > { %s781_s5 = scalar_lea.hbm %s1460_s3, %s1011_s15  ;;  %s768_s8 = scalar_lea.sflag [#allocation4], %s197_s29 }
 0x102   : > { %s784_s7 = sshll.u32 %s781_s5, 4  ;;  %s1109_s16 = scalar_lea.hbm %s1460_s3, 1024  ;;  %s785_s7 = int_to_ptr.hbm [resolvable:$true] %s784_s7 }
 0x103   : > { %s1103_s10 = sshra.s32 %s785_s7, 4  ;;  %s1104_s10 = int_to_ptr.hbm [resolvable:$true] %s1103_s10 }
 0x104   : > { %s1105_s11 = scalar_lea.hbm %s1104_s10, 32  ;;  %p1110_p5 = scmp.lt.s32.totalorder %s1104_s10, %s1460_s3 }
 0x105   : > { %p1106_p1 = scmp.ne.s32.totalorder %s1104_s10, %s1105_s11  ;;  %p1111_p6 = scmp.lt.s32.totalorder %s1109_s16, %s1105_s11 }
 0x107   : > { %p1107_p2 = pnand %p1106_p1, %p1257_p3  ;;  %p1112_p7 = por %p1111_p6, %p1110_p5 }
 0x109   : > { %p1108_p4 = pneg %p1107_p2 }
 0x10b   : > { %p1113_p8 = pnand %p1112_p7, %p1108_p4 }
 0x10d   : > { %1116 = shalt.err (!%p1113_p8)
}
 0x10e   : > { %s1186_s29 = smov 128   ;;  %s1187_s9 = smov 8  }
 0x10f   : > { %1014 = dma.vmem_to_hbm [thread:$0]  (%p1257_p3), %s783_s6, 512, %s785_s7, %s768_s8, %s1186_s29, %s1186_s29, %s1187_s9  }
 0x110 PF: > { %p1020_p10 = scmp.ge.s32.totalorder %s1183_s19, 2  ;;  %s799_s15 = sand.u32 1, %s1155_s12  }
 0x111   : > { %s800_s30 = scalar_lea.sflag [#allocation4], %s799_s15 }
 0x112   : > { %p1017_p11 = pnand %p1020_p10, %p1267_p9 }
 0x114   : > { %p1018_p12 = pneg %p1017_p11 }
 0x116   : > { %1150 = dma.done.wait (%p1018_p12), %s800_s30, 512  }
 0x117   : > { %1152 = vsyncadd (%p1018_p12), %s800_s30, 4294966784  ;;  %s16_s19 = sadd.s32 1, %s1183_s19   ;;  %s1463_s12 = smov %s1159_s13 }
 0x118   : > { %p13_p13 = scmp.ge.s32.totalorder %s16_s19, 226   ;;  %s1464_s13 = smov %s1163_s14 }
 0x119   : > { %s1465_s14 = smov %s1275_s28  ;;  %s1466_s15 = smov %s1175_s17 }
 0x11a   : > { %s1467_s16 = smov %s1179_s18  ;;  %s1468_s17 = smov %s1471_s22 }
 0x11b   : > { %s1469_s18 = smov %s1475_s23  ;;  %15 = sbr.rel (!%p13_p13) target bundleno = 5 (0x5), region = 82 }
 0x120   :  { %806 = vsyncpa [#allocation4], 1 }
 0x121   :  { %808 = vsyncpa [#allocation4 + $0x1], 1 }

</bundles_post_ra>
